<compile_context>
chip_gen: v7x
topology: tpu7x:2x2x1
jax: 0.10.0
libtpu: 0.0.40
codegen_flags: <defaults>
</compile_context>

<pallas_src>
import jax
import jax.numpy as jnp
from jax.experimental import pallas as pl
from jax.experimental.pallas import tpu as pltpu

_SQRT_2_OVER_PI = 0.7978845608028654


def _gelu_tanh_f32(x):
    # tanh-approximate GELU in f32 (v5e has no bf16 VPU/EUP; tanh runs on the EUP slot).
    return 0.5 * x * (1.0 + jnp.tanh(_SQRT_2_OVER_PI * (x + 0.044715 * x * x * x)))


def _to_bf16(x):
    return x if x.dtype == jnp.bfloat16 else x.astype(jnp.bfloat16)


# ----------------------------------------------------------------------------
# Kernels
# ----------------------------------------------------------------------------

def _ffn_kernel_resident(x_ref, w1_ref, b1_ref, w2_ref, b2_ref, o_ref):
    """One row-tile of y = GELU(x @ W1 + b1) @ W2 + b2 with W1/W2 fully resident.

    bf16 MXU operands, f32 accumulation + f32 bias/GELU epilogue; the (tm, H)
    intermediate never leaves VMEM/vregs.
    """
    x = _to_bf16(x_ref[...])                                              # (tm, K)
    h = jnp.dot(x, w1_ref[...], preferred_element_type=jnp.float32)      # (tm, H) f32
    h = _gelu_tanh_f32(h + b1_ref[...])
    y = jnp.dot(_to_bf16(h), w2_ref[...], preferred_element_type=jnp.float32)
    o_ref[...] = (y + b2_ref[...]).astype(o_ref.dtype)


def _ffn_kernel_hchunk(x_ref, w1_ref, b1_ref, w2_ref, b2_ref, o_ref, acc_ref):
    """Hidden-axis-chunked variant: grid = (row blocks, H // tH), H axis last.

    Streams W1 column-chunks / W2 row-chunks and accumulates the output row tile
    in a f32 VMEM scratch.
    """
    h_idx = pl.program_id(1)

    @pl.when(h_idx == 0)
    def _():
        acc_ref[...] = jnp.zeros_like(acc_ref)

    x = _to_bf16(x_ref[...])                                              # (tm, K)
    h = jnp.dot(x, w1_ref[...], preferred_element_type=jnp.float32)      # (tm, tH)
    h = _gelu_tanh_f32(h + b1_ref[...])
    acc_ref[...] += jnp.dot(_to_bf16(h), w2_ref[...],
                            preferred_element_type=jnp.float32)

    @pl.when(h_idx == pl.num_programs(1) - 1)
    def _():
        o_ref[...] = (acc_ref[...] + b2_ref[...]).astype(o_ref.dtype)


# ----------------------------------------------------------------------------
# Wrapper
# ----------------------------------------------------------------------------

def _vmem_capacity_bytes():
    try:
        return int(pltpu.get_tpu_info().vmem_capacity_bytes)
    except Exception:
        return 64 << 20  # conservative (v7x-class) default


def _pick_row_tile(M, block_rows):
    """Sublane(8)-aligned row tile; >= 2 blocks when M allows (v7x megacore);
    prefer a tile that divides M so the wrapper never pads/slices."""
    target = min(block_rows, M)
    if M >= 16:
        target = min(target, M // 2)          # guarantee at least two row blocks
    target = max(8, (target // 8) * 8)
    if M % 8 == 0:
        floor = max(8, ((target // 4) // 8) * 8)
        t = target
        while t >= floor:
            if M % t == 0:
                return t
            t -= 8
    return target


def _hchunk_step_bytes(tH, tm, K, N, x_bytes, o_bytes):
    return (2 * tm * K * x_bytes            # x tile (double-buffered)
            + 2 * tm * N * o_bytes          # out tile (double-buffered)
            + 2 * (K * tH + tH * N) * 2     # bf16 W1/W2 chunks (double-buffered)
            + 2 * tH * 4 + N * 4            # bias chunks
            + tm * tH * 4                   # f32 intermediate
            + tm * N * 4)                   # f32 accumulator scratch


def _pick_h_tile(H, tm, K, N, x_bytes, o_bytes, budget):
    """Largest multiple of 128 dividing H whose per-step footprint fits `budget`."""
    best = 128
    for tH in range(128, H + 1, 128):
        if H % tH == 0 and _hchunk_step_bytes(tH, tm, K, N, x_bytes, o_bytes) <= budget:
            best = tH
    return best


def feed_forward_pallas(x, params, *, block_rows=512, force_h_chunked=False, h_chunk=None):
    """x: (..., dim), any float dtype (bf16 recommended -- the kernel is HBM-bound).
    params: W1 (dim, hidden) bf16, b1 (1, hidden) f32, W2 (hidden, dim) bf16,
            b2 (1, dim) f32.  Returns (..., dim) in x.dtype."""
    W1, b1, W2, b2 = params["W1"], params["b1"], params["W2"], params["b2"]
    orig_shape = x.shape
    K = orig_shape[-1]
    H = W1.shape[1]
    N = W2.shape[1]

    x2 = x.reshape(-1, K)
    M = x2.shape[0]
    out_dtype = x.dtype
    x_bytes = jnp.dtype(x.dtype).itemsize
    o_bytes = jnp.dtype(out_dtype).itemsize

    tm = _pick_row_tile(M, block_rows)
    n_blocks = pl.cdiv(M, tm)
    Mp = n_blocks * tm
    if Mp != M:
        # TODO(synk): handle the ragged tail with an in-kernel masked store instead of
        # this extra HBM round trip (only hit when M has no usable 8-multiple divisor).
        x2 = jnp.pad(x2, ((0, Mp - M), (0, 0)))

    vmem_cap = _vmem_capacity_bytes()
    budget = int(0.60 * vmem_cap)           # headroom for compiler scratch / spills

    weight_bytes = (K * H + H * N) * 2      # bf16, single-buffered
    resident_step = (2 * tm * K * x_bytes + 2 * tm * N * o_bytes
                     + weight_bytes + (H + N) * 4 + tm * H * 4)

    h_chunk_ok = (H % 128 == 0)
    want_h_chunked = h_chunk_ok and (force_h_chunked or resident_step > budget)

    single = pl.Buffered(1)   # constant-index blocks: no re-DMA, one VMEM buffer

    if not want_h_chunked:
        # Fast path: W1/W2 fully resident in VMEM, single HBM pass over activations.
        step_bytes = resident_step
        grid = (n_blocks,)
        in_specs = [
            pl.BlockSpec((tm, K), lambda i: (i, 0)),                        # x row tile
            pl.BlockSpec((K, H), lambda i: (0, 0), pipeline_mode=single),   # W1 resident
            pl.BlockSpec((1, H), lambda i: (0, 0), pipeline_mode=single),   # b1
            pl.BlockSpec((H, N), lambda i: (0, 0), pipeline_mode=single),   # W2 resident
            pl.BlockSpec((1, N), lambda i: (0, 0), pipeline_mode=single),   # b2
        ]
        out_specs = pl.BlockSpec((tm, N), lambda i: (i, 0))
        scratch_shapes = []
        kernel = _ffn_kernel_resident
        dims = ("parallel",)
        weight_traffic = weight_bytes
    else:
        # Large-model path: stream the hidden axis (trailing "arbitrary" grid axis).
        if h_chunk is not None:
            assert h_chunk % 128 == 0 and H % h_chunk == 0
            tH = h_chunk
        else:
            tH = _pick_h_tile(H, tm, K, N, x_bytes, o_bytes, budget)
        step_bytes = _hchunk_step_bytes(tH, tm, K, N, x_bytes, o_bytes)
        grid = (n_blocks, H // tH)
        in_specs = [
            pl.BlockSpec((tm, K), lambda i, h: (i, 0)),                      # x row tile
            pl.BlockSpec((K, tH), lambda i, h: (0, h)),                      # W1 col-chunk
            pl.BlockSpec((1, tH), lambda i, h: (0, h)),                      # b1 chunk
            pl.BlockSpec((tH, N), lambda i, h: (h, 0)),                      # W2 row-chunk
            pl.BlockSpec((1, N), lambda i, h: (0, 0), pipeline_mode=single),  # b2
        ]
        out_specs = pl.BlockSpec((tm, N), lambda i, h: (i, 0))
        scratch_shapes = [pltpu.VMEM((tm, N), jnp.float32)]
        kernel = _ffn_kernel_hchunk
        dims = ("parallel", "arbitrary")
        weight_traffic = n_blocks * weight_bytes      # chunks re-streamed per row block

    vmem_limit = int(min(0.85 * vmem_cap, max(2 * step_bytes, 16 << 20)))

    cost = pl.CostEstimate(
        flops=2 * Mp * (K * H + H * N),
        transcendentals=Mp * H,                       # one tanh per hidden activation
        bytes_accessed=(Mp * K * x_bytes + Mp * N * o_bytes
                        + weight_traffic + (H + N) * 4),
    )

    out = pl.pallas_call(
        kernel,
        out_shape=jax.ShapeDtypeStruct((Mp, N), out_dtype),
        grid=grid,
        in_specs=in_specs,
        out_specs=out_specs,
        scratch_shapes=scratch_shapes,
        compiler_params=pltpu.CompilerParams(
            dimension_semantics=dims,
            vmem_limit_bytes=vmem_limit,
        ),
        cost_estimate=cost,
    )(x2, W1, b1, W2, b2)

    if Mp != M:
        out = out[:M]
    return out.reshape(orig_shape[:-1] + (N,))


# ----------------------------------------------------------------------------
# Parameter init + pure-JAX reference
# ----------------------------------------------------------------------------

def init_feed_forward(key, dim, hidden_dim, scale=0.05):
    k1, k2, k3, k4 = jax.random.split(key, 4)
    W1 = jax.random.normal(k1, (dim, hidden_dim), jnp.float32) * scale
    b1 = jax.random.normal(k2, (hidden_dim,), jnp.float32) * scale
    W2 = jax.random.normal(k3, (hidden_dim, dim), jnp.float32) * scale
    b2 = jax.random.normal(k4, (dim,), jnp.float32) * scale
    master = {"W1": W1, "b1": b1, "W2": W2, "b2": b2}
    # Kernel-side copies: bf16 weights (halved HBM traffic, bf16 MXU path),
    # f32 biases for the f32 epilogue.
    kernel_params = {
        "W1": W1.astype(jnp.bfloat16),
        "b1": b1.reshape(1, hidden_dim),
        "W2": W2.astype(jnp.bfloat16),
        "b2": b2.reshape(1, dim),
    }
    return master, kernel_params


def feed_forward_ref(x, master):
    # Pure-JAX f32 reference with the same tanh-GELU (dropout = identity).
    h = x @ master["W1"] + master["b1"]
    h = 0.5 * h * (1.0 + jnp.tanh(_SQRT_2_OVER_PI * (h + 0.044715 * h * h * h)))
    return h @ master["W2"] + master["b2"]


# ----------------------------------------------------------------------------
# Main
# ----------------------------------------------------------------------------

if __name__ == "__main__":
    B, S = 2, 64
    dim, hidden_dim = 128, 256               # lane-dense (multiples of 128)

    key = jax.random.PRNGKey(0)
    kp, kx = jax.random.split(key)
    master, kernel_params = init_feed_forward(kp, dim, hidden_dim)

    # bf16 activation I/O: the kernel is HBM-bound, so x/y travel in bf16.
    x = jax.random.normal(kx, (B, S, dim), jnp.float32).astype(jnp.bfloat16)

    y_ref = feed_forward_ref(x.astype(jnp.float32), master)

    # Fast path: weights fully resident in VMEM; row grid -> 2 blocks (v7x megacore).
    y = jax.block_until_ready(feed_forward_pallas(x, kernel_params))
    assert y.shape == (B, S, dim) and y.dtype == jnp.bfloat16
    y32 = y.astype(jnp.float32)
    assert bool(jnp.all(jnp.isfinite(y32)))
    err = float(jnp.max(jnp.abs(y32 - y_ref)))
    # bf16 activations/weights vs f32 reference -> loose tolerance (intentional).
    assert err < 6e-2, err

    # Large-model path (auto-selected when W1/W2 exceed the VMEM budget); forced here
    # with 2 hidden chunks to exercise the accumulation/init/store logic.
    y2 = jax.block_until_ready(
        feed_forward_pallas(x, kernel_params, force_h_chunked=True, h_chunk=128))
    err2 = float(jnp.max(jnp.abs(y2.astype(jnp.float32) - y_ref)))
    assert err2 < 6e-2, err2

    print("KERNEL_OK")
</pallas_src>

<mosaic_0001>
module attributes {stable_mosaic.version = 11 : i64} {
  func.func @_ffn_kernel_resident(%arg0: i32, %arg1: memref<64x128xbf16, #tpu.memory_space<vmem>>, %arg2: memref<128x256xbf16, #tpu.memory_space<vmem>>, %arg3: memref<1x256xf32, #tpu.memory_space<vmem>>, %arg4: memref<256x128xbf16, #tpu.memory_space<vmem>>, %arg5: memref<1x128xf32, #tpu.memory_space<vmem>>, %arg6: memref<64x128xbf16, #tpu.memory_space<vmem>>) attributes {dimension_semantics = [#tpu.dimension_semantics<parallel>], iteration_bounds = array<i64: 2>, scalar_prefetch = 0 : i64, scratch_operands = 0 : i64, tpu.core_type = #tpu.core_type<tc>, window_params = [{transform_indices = @transform_0, window_bounds = array<i64: 64, 128>}, {pipeline_mode = #tpu.pipeline_mode<synchronous>, transform_indices = @transform_1, window_bounds = array<i64: 128, 256>}, {pipeline_mode = #tpu.pipeline_mode<synchronous>, transform_indices = @transform_2, window_bounds = array<i64: 1, 256>}, {pipeline_mode = #tpu.pipeline_mode<synchronous>, transform_indices = @transform_3, window_bounds = array<i64: 256, 128>}, {pipeline_mode = #tpu.pipeline_mode<synchronous>, transform_indices = @transform_4, window_bounds = array<i64: 1, 128>}, {transform_indices = @transform_5, window_bounds = array<i64: 64, 128>}]} {
    %c0 = arith.constant 0 : index
    %c0_0 = arith.constant 0 : index
    %0 = vector.load %arg1[%c0, %c0_0] : memref<64x128xbf16, #tpu.memory_space<vmem>>, vector<64x128xbf16>
    %c0_1 = arith.constant 0 : index
    %c0_2 = arith.constant 0 : index
    %1 = vector.load %arg2[%c0_1, %c0_2] : memref<128x256xbf16, #tpu.memory_space<vmem>>, vector<128x256xbf16>
    %cst = arith.constant dense<0.000000e+00> : vector<64x256xf32>
    %2 = tpu.matmul %0, %1, %cst {dimension_numbers = #tpu.dot_dimension_numbers<[1], [0], [0], [1], [0, 0, 1, 1], [], []>} : vector<64x128xbf16>, vector<128x256xbf16>, vector<64x256xf32> -> vector<64x256xf32>
    %c0_3 = arith.constant 0 : index
    %c0_4 = arith.constant 0 : index
    %3 = vector.load %arg3[%c0_3, %c0_4] : memref<1x256xf32, #tpu.memory_space<vmem>>, vector<1x256xf32>
    %4 = vector.broadcast %3 : vector<1x256xf32> to vector<64x256xf32>
    %5 = arith.addf %2, %4 : vector<64x256xf32>
    %cst_5 = arith.constant 5.000000e-01 : f32
    %6 = vector.broadcast %cst_5 : f32 to vector<64x256xf32>
    %7 = arith.mulf %6, %5 : vector<64x256xf32>
    %cst_6 = arith.constant 4.471500e-02 : f32
    %8 = vector.broadcast %cst_6 : f32 to vector<64x256xf32>
    %9 = arith.mulf %8, %5 : vector<64x256xf32>
    %10 = arith.mulf %9, %5 : vector<64x256xf32>
    %11 = arith.mulf %10, %5 : vector<64x256xf32>
    %12 = arith.addf %5, %11 : vector<64x256xf32>
    %cst_7 = arith.constant 0.797884583 : f32
    %13 = vector.broadcast %cst_7 : f32 to vector<64x256xf32>
    %14 = arith.mulf %13, %12 : vector<64x256xf32>
    %15 = math.tanh %14 : vector<64x256xf32>
    %cst_8 = arith.constant 1.000000e+00 : f32
    %16 = vector.broadcast %cst_8 : f32 to vector<64x256xf32>
    %17 = arith.addf %16, %15 : vector<64x256xf32>
    %18 = arith.mulf %7, %17 : vector<64x256xf32>
    %19 = arith.truncf %18 : vector<64x256xf32> to vector<64x256xbf16>
    %c0_9 = arith.constant 0 : index
    %c0_10 = arith.constant 0 : index
    %20 = vector.load %arg4[%c0_9, %c0_10] : memref<256x128xbf16, #tpu.memory_space<vmem>>, vector<256x128xbf16>
    %cst_11 = arith.constant dense<0.000000e+00> : vector<64x128xf32>
    %21 = tpu.matmul %19, %20, %cst_11 {dimension_numbers = #tpu.dot_dimension_numbers<[1], [0], [0], [1], [0, 0, 1, 1], [], []>} : vector<64x256xbf16>, vector<256x128xbf16>, vector<64x128xf32> -> vector<64x128xf32>
    %c0_12 = arith.constant 0 : index
    %c0_13 = arith.constant 0 : index
    %22 = vector.load %arg5[%c0_12, %c0_13] : memref<1x128xf32, #tpu.memory_space<vmem>>, vector<1x128xf32>
    %23 = vector.broadcast %22 : vector<1x128xf32> to vector<64x128xf32>
    %24 = arith.addf %21, %23 : vector<64x128xf32>
    %25 = arith.truncf %24 : vector<64x128xf32> to vector<64x128xbf16>
    %c0_14 = arith.constant 0 : index
    %c0_15 = arith.constant 0 : index
    %26 = vector.load %arg6[%c0_14, %c0_15] : memref<64x128xbf16, #tpu.memory_space<vmem>>, vector<64x128xbf16>
    tpu.vector_store %arg6[%c0_14, %c0_15], %25 {strides = array<i32>} : memref<64x128xbf16, #tpu.memory_space<vmem>>, vector<64x128xbf16>,
    return
  }
  func.func @transform_0(%arg0: i32) -> (i32, i32) {
    %c0_i32 = arith.constant 0 : i32
    %c0_i32_0 = arith.constant 0 : i32
    return %arg0, %c0_i32 : i32, i32
  }
  func.func @transform_1(%arg0: i32) -> (i32, i32) {
    %c0_i32 = arith.constant 0 : i32
    %c0_i32_0 = arith.constant 0 : i32
    %c0_i32_1 = arith.constant 0 : i32
    return %c0_i32, %c0_i32_0 : i32, i32
  }
  func.func @transform_2(%arg0: i32) -> (i32, i32) {
    %c0_i32 = arith.constant 0 : i32
    %c0_i32_0 = arith.constant 0 : i32
    %c0_i32_1 = arith.constant 0 : i32
    return %c0_i32, %c0_i32_0 : i32, i32
  }
  func.func @transform_3(%arg0: i32) -> (i32, i32) {
    %c0_i32 = arith.constant 0 : i32
    %c0_i32_0 = arith.constant 0 : i32
    %c0_i32_1 = arith.constant 0 : i32
    return %c0_i32, %c0_i32_0 : i32, i32
  }
  func.func @transform_4(%arg0: i32) -> (i32, i32) {
    %c0_i32 = arith.constant 0 : i32
    %c0_i32_0 = arith.constant 0 : i32
    %c0_i32_1 = arith.constant 0 : i32
    return %c0_i32, %c0_i32_0 : i32, i32
  }
  func.func @transform_5(%arg0: i32) -> (i32, i32) {
    %c0_i32 = arith.constant 0 : i32
    %c0_i32_0 = arith.constant 0 : i32
    return %arg0, %c0_i32 : i32, i32
  }
}

</mosaic_0001>

<bundles_post_ra>
// kernel: tpu_custom_call.1
= control target key start
LH: loop header
LB: loop body
LE: loop exit
PB: predicated region body
PF: predicated region fallthrough
CT: control target
= control target key end

     0   :  { %10 = vsyncpa [#allocation3], 0  ;;  %s1845_s0 = inlined_call_operand.hbm [shape: bf16[128,128], index: 0, kind: input, shape index: {}]   ;;  %s1846_s1 = inlined_call_operand.hbm [shape: bf16[128,256], index: 1, kind: input, shape index: {}]   ;;  %s1847_s2 = inlined_call_operand.vmem [shape: f32[1,256], index: 2, kind: input, shape index: {}]   ;;  %s1848_s3 = inlined_call_operand.hbm [shape: bf16[256,128], index: 3, kind: input, shape index: {}]   ;;  %s1849_s4 = inlined_call_operand.vmem [shape: f32[1,128], index: 4, kind: input, shape index: {}]   ;;  %s1850_s5 = inlined_call_operand.hbm [shape: bf16[128,128], index: 5, kind: output, shape index: {}]  }
   0x1   :  { %12 = vsyncpa [#allocation3 + $0x1], 0 }
   0x2   :  { %13 = vsyncpa [#allocation6], 0 }
   0x3   :  { %14 = vsyncpa [#allocation4], 0 }
   0x4   :  { %16 = vsyncpa [#allocation4 + $0x1], 0  ;;  %s1471_s18 = smov 0   ;;  %s1473_s19 = smov 0  }
   0x5   :  { %s1475_s20 = smov 0   ;;  %s1477_s21 = smov 0  }
   0x6 LB: > { %s1492_s22 = sadd.s32 4294967295, %s1428_s21   ;;  %s986_s23 = sadd.s32 4294967294, %s1428_s21   ;;  %s1428_s21 = sphi %s1477_s21, %s1870_s21   ;;  %s1424_s20 = sphi %s1475_s20, %s1869_s20   ;;  %s1420_s19 = sphi %s1473_s19, %s1868_s19   ;;  %s1416_s18 = sphi %s1471_s18, %s1867_s18  }
   0x7   : > { %p42_p0 = scmp.ne.s32.totalorder %s1420_s19, %s1416_s18  ;;  %p1851_p1 = scmp.eq.s32.totalorder %s1492_s22, 0 }
   0x8   : > { %p156_p3 = scmp.eq.s32.totalorder %s986_s23, 1  ;;  %p987_p5 = scmp.ge.s32.totalorder %s1428_s21, 1 }
   0x9   : > { %p1501_p4 = por %p1851_p1, %p42_p0  ;;  %p163_p7 = scmp.lt.s32.totalorder %s1428_s21, 3 }
   0xa   : > { %p1506_p6 = por %p156_p3, %p42_p0  ;;  %s1430_s27 = smov [#allocation5]  }
   0xb   : > { %s1854_s24 = scalar_select %p1501_p4, 1, 0 }
   0xc   : > { %s1855_s25 = scalar_select %p1506_p6, 1, 0 }
   0xd   : > { %p1511_p8 = pnand %p987_p5, %p163_p7  ;;  %s175_s28 = sshll.u32 %s1430_s27, 4  ;;  %s1515_s28 = int_to_ptr.vmem [resolvable:$true] %s175_s28 }
   0xe   : > { %s1431_s30 = smov [#allocation7]   ;;  %s1272_s9 = scalar_lea.hbm %s1846_s1, 2048 }
   0xf   : > { %p1134_p9 = pneg %p1511_p8  ;;  %s191_s6 = sshll.u32 %s1431_s30, 4  ;;  %s1526_s6 = int_to_ptr.vmem [resolvable:$true] %s191_s6 }
  0x10   : > { %p1273_p12 = scmp.ne.s32.totalorder %s1846_s1, %s1272_s9  ;;  %p1279_p5 = scmp.lt.u32.totalorder %s1272_s9, %s1846_s1 }
  0x11   : > { %p1522_p11 = pnand %p1134_p9, %p1851_p1 }
  0x13   : > { %p1274_p13 = pneg %p1522_p11 }
  0x15   : > { %p1275_p0 = pnand %p1274_p13, %p1273_p12 }
  0x17   : > { %p1276_p3 = pneg %p1275_p0 }
  0x19   : > { %p1281_p7 = pnand %p1279_p5, %p1276_p3 }
  0x1b   : > { %1284 = shalt.err (!%p1281_p7)
}
  0x1c   : > { %s1285_s14 = scalar_lea.vmem %s1515_s28, 2048  ;;  %p1293_p2 = scmp.lt.s32.totalorder %s1515_s28, %s1515_s28 }
  0x1d   : > { %p1286_p9 = scmp.ne.s32.totalorder %s1515_s28, %s1285_s14  ;;  %p1294_p12 = scmp.lt.s32.totalorder %s1285_s14, %s1285_s14 }
  0x1f   : > { %p1288_p10 = pnand %p1286_p9, %p1274_p13  ;;  %p1295_p0 = por %p1294_p12, %p1293_p2 }
  0x21   : > { %p1289_p1 = pneg %p1288_p10 }
  0x23   : > { %p1296_p6 = pnand %p1295_p0, %p1289_p1 }
  0x25   : > { %1299 = shalt.err (!%p1296_p6)
}
  0x26   : > { %s1432_s15 = smov 128   ;;  %s1433_s16 = smov 8  }
  0x27   : > { %1137 = dma.hbm_to_vmem [thread:$0]  (!%p1522_p11), %s1846_s1, 2048, %s1515_s28, [#allocation6], %s1432_s15, %s1432_s15, %s1433_s16  }
  0x28   : > { %s1300_s7 = scalar_lea.hbm %s1848_s3, 2048 }
  0x29   : > { %p1301_p2 = scmp.ne.s32.totalorder %s1848_s3, %s1300_s7  ;;  %p1307_p10 = scmp.lt.u32.totalorder %s1300_s7, %s1848_s3 }
  0x2b   : > { %p1303_p1 = pnand %p1301_p2, %p1274_p13 }
  0x2d   : > { %p1304_p6 = pneg %p1303_p1 }
  0x2f   : > { %p1309_p3 = pnand %p1307_p10, %p1304_p6 }
  0x31   : > { %1312 = shalt.err (!%p1309_p3)
}
  0x32   : > { %s1313_s28 = scalar_lea.vmem %s1526_s6, 2048  ;;  %p1321_p12 = scmp.lt.s32.totalorder %s1526_s6, %s1526_s6 }
  0x33   : > { %p1314_p5 = scmp.ne.s32.totalorder %s1526_s6, %s1313_s28  ;;  %p1322_p0 = scmp.lt.s32.totalorder %s1313_s28, %s1313_s28 }
  0x35   : > { %p1316_p7 = pnand %p1314_p5, %p1274_p13  ;;  %p1323_p2 = por %p1322_p0, %p1321_p12 }
  0x37   : > { %p1317_p9 = pneg %p1316_p7 }
  0x39   : > { %p1324_p1 = pnand %p1323_p2, %p1317_p9 }
  0x3b   : > { %1327 = shalt.err (!%p1324_p1)
}
  0x3c   : > { %s1434_s12 = smov 64   ;;  %s1435_s13 = smov 4  }
  0x3d   : > { %1140 = dma.hbm_to_vmem [thread:$0]  (!%p1522_p11), %s1848_s3, 2048, %s1526_s6, [#allocation6], %s1434_s12, %s1434_s12, %s1435_s13  }
  0x3e   : > { %s1584_s16 = sadd.s32 1, %s1428_s21   ;;  %s29_s23 = sadd.s32 1, %s1424_s20 }
  0x3f   : > { %s26_s17 = ssub.s32 %s1428_s21, %s1584_s16  ;;  %p36_p6 = scmp.ne.s32.totalorder %s1424_s20, %s1420_s19 }
  0x40   : > { %p27_p13 = scmp.eq.s32.totalorder %s26_s17, 0  ;;  %p37_p10 = scmp.eq.s32.totalorder %s1428_s21, 0 }
  0x41   : > { %p1858_p5 = scmp.eq.s32.totalorder %s1492_s22, 1  ;;  %p1151_p9 = scmp.lt.s32.totalorder %s1428_s21, 2 }
  0x42   : > { %s1593_s27 = scalar_select %p27_p13, %s1424_s20, %s29_s23  }
  0x43   : > { %p38_p3 = por %p37_p10, %p36_p6  ;;  %p1597_p7 = por %p1858_p5, %p36_p6 }
  0x44   : > { %s208_s30 = sand.u32 1, %s1424_s20   ;;  %s1049_s6 = sshll.u32 %s1428_s21, 9 }
  0x45   : > { %s1859_s29 = scalar_select %p1597_p7, 1, 0 }
  0x46   : > { %s991_s7 = sshll.u32 %s208_s30, 5  ;;  %s1607_s10 = scalar_lea.hbm %s1845_s0, %s1049_s6 }
  0x47   : > { %s212_s11 = scalar_lea.vmem [#allocation2], %s991_s7  ;;  %p1611_p11 = pnand %p1151_p9, %p38_p3 }
  0x48   : > { %s219_s28 = sshll.u32 %s212_s11, 4  ;;  %s1615_s15 = scalar_lea.sflag [#allocation3], %s208_s30  ;;  %s1609_s28 = int_to_ptr.vmem [resolvable:$true] %s219_s28 }
  0x49   : > { %s1328_s17 = scalar_lea.hbm %s1607_s10, 512  ;;  %p1330_p0 = pneg %p1611_p11 }
  0x4a   : > { %p1329_p12 = scmp.ne.s32.totalorder %s1607_s10, %s1328_s17  ;;  %s1333_s6 = scalar_lea.hbm %s1845_s0, 1024 }
  0x4b   : > { %p1334_p13 = scmp.lt.u32.totalorder %s1607_s10, %s1845_s0  ;;  %p1335_p6 = scmp.lt.u32.totalorder %s1333_s6, %s1328_s17 }
  0x4c   : > { %p1331_p2 = pnand %p1330_p0, %p1329_p12  ;;  %p1337_p3 = scmp.lt.u32.totalorder %s1328_s17, %s1607_s10 }
  0x4d   : > { %p1336_p10 = por %p1335_p6, %p1334_p13 }
  0x4e   : > { %p1332_p1 = pneg %p1331_p2 }
  0x4f   : > { %p1338_p5 = por %p1337_p3, %p1336_p10 }
  0x51   : > { %p1339_p9 = pnand %p1338_p5, %p1332_p1 }
  0x53   : > { %1342 = shalt.err (!%p1339_p9)
}
  0x54   : > { %s1343_s30 = scalar_lea.vmem %s1609_s28, 512  ;;  %s1436_s11 = smov [#allocation2]  }
  0x55   : > { %p1344_p12 = scmp.ne.s32.totalorder %s1609_s28, %s1343_s30  ;;  %s1348_s23 = sshll.u32 %s1436_s11, 4  ;;  %s1349_s23 = int_to_ptr.vmem [resolvable:$false] %s1348_s23 }
  0x56   : > { %s1350_s7 = scalar_lea.vmem %s1349_s23, 1024  ;;  %p1351_p4 = scmp.lt.s32.totalorder %s1609_s28, %s1349_s23 }
  0x57   : > { %p1346_p2 = pnand %p1344_p12, %p1330_p0  ;;  %p1352_p13 = scmp.lt.s32.totalorder %s1350_s7, %s1343_s30 }
  0x59   : > { %p1347_p7 = pneg %p1346_p2  ;;  %p1353_p6 = por %p1352_p13, %p1351_p4 }
  0x5b   : > { %p1354_p10 = pnand %p1353_p6, %p1347_p7 }
  0x5d   : > { %1357 = shalt.err (!%p1354_p10)
}
  0x5e   : > { %1144 = dma.hbm_to_vmem [thread:$0]  (!%p1611_p11), %s1607_s10, 512, %s1609_s28, %s1615_s15, %s1434_s12, %s1434_s12, %s1435_s13  }
  0x5f   : > { %231 = sbr.rel (%p1511_p8) target bundleno = 648 (0x288), region = 40  ;;  %s1649_s17 = sand.u32 (!%p1511_p8), 1, %s1420_s19  }
  0x60   : > { %s995_s6 = sshll.u32 (!%p1511_p8), %s1649_s17, 5  ;;  %s234_s8 = scalar_lea.sflag (!%p1511_p8), [#allocation3], %s1649_s17 }
  0x61   : > { %s1655_s14 = scalar_lea.vmem (!%p1511_p8), [#allocation2], %s995_s6  ;;  %p1861_p4 = scmp.ne.s32.totalorder (!%p1511_p8), %s1854_s24, 0 }
  0x66   : > { %1403 = dma.done.wait (%p1861_p4), %s234_s8, 512  }
  0x67   : > { %1405 = vsyncadd (%p1861_p4), %s234_s8, 4294966784  ;;  %p1862_p7 = scmp.eq.s32.totalorder %s1492_s22, 0 }
  0x69   : > { %1407 = dma.done.wait (%p1862_p7), [#allocation6], 4096   ;;  %p1863_p8 = pmov %p1862_p7 }
  0x6a   : > { %v1437_v0 = vmov 0   ;;  %v1196_v1 = vld [vmem:[#allocation5 + $0x4] ss:$8 sps:$4 sm:$0xff]   ;;  %v1198_v2 = vld [vmem:[#allocation5] ss:$8 sps:$4 sm:$0xff]   ;;  %v1222_v19 = vld [vmem:[%s1655_s14 + $0x10] sm:$0xff]   ;;  %v301_v37 = vlaneseq }
  0x6b   : > { %1409 = vsyncadd (%p1863_p8), [#allocation6], 4294963200  ;;  %447 = vmatprep.mubr.bf16.mxu0 %v1437_v0  ;;  %415 = vmatprep.subr.bf16.mxu0 %v1196_v1  ;;  %v1199_v3 = vld [vmem:[#allocation5 + $0x14] ss:$8 sps:$4 sm:$0xff]   ;;  %v1201_v4 = vld [vmem:[#allocation5 + $0x10] ss:$8 sps:$4 sm:$0xff]  }
  0x6c   : > { %416 = vmatpush1.bf16.msra.mxu0 %v1198_v2  ;;  %v1202_v5 = vld [vmem:[#allocation5 + $0x24] ss:$8 sps:$4 sm:$0xff]   ;;  %v1204_v6 = vld [vmem:[#allocation5 + $0x20] ss:$8 sps:$4 sm:$0xff]   ;;  %v1205_v7 = vld [vmem:[#allocation5 + $0x34] ss:$8 sps:$4 sm:$0xff]  }
  0x6d   : > { %417 = vmatprep.subr.bf16.mxu0 %v1199_v3  ;;  %v1207_v8 = vld [vmem:[#allocation5 + $0x30] ss:$8 sps:$4 sm:$0xff]   ;;  %v1208_v9 = vld [vmem:[#allocation5 + $0x44] ss:$8 sps:$4 sm:$0xff]   ;;  %v1210_v10 = vld [vmem:[#allocation5 + $0x40] ss:$8 sps:$4 sm:$0xff]  }
  0x6e   : > { %v1211_v11 = vld [vmem:[#allocation5 + $0x54] ss:$8 sps:$4 sm:$0xff]   ;;  %v1213_v12 = vld [vmem:[#allocation5 + $0x50] ss:$8 sps:$4 sm:$0xff]   ;;  %v1214_v13 = vld [vmem:[#allocation5 + $0x64] ss:$8 sps:$4 sm:$0xff]  }
  0x6f   : > { %v1216_v14 = vld [vmem:[#allocation5 + $0x60] ss:$8 sps:$4 sm:$0xff]   ;;  %v1217_v15 = vld [vmem:[#allocation5 + $0x74] ss:$8 sps:$4 sm:$0xff]   ;;  %v1219_v16 = vld [vmem:[#allocation5 + $0x70] ss:$8 sps:$4 sm:$0xff]  }
  0x70   : > { %418 = vmatpush1.bf16.msra.mxu0 %v1201_v4  ;;  %v1220_v17 = vld [vmem:[%s1655_s14] sm:$0xff]   ;;  %v1221_v18 = vld [vmem:[%s1655_s14 + $0x8] sm:$0xff]   ;;  %v1223_v20 = vld [vmem:[%s1655_s14 + $0x18] sm:$0xff]   ;;  %v302_v38 = vshrl.u32 %v301_v37, 7  ;;  %s1788_s10 = scalar_lea.vmem [#allocation8], %s995_s6  ;;  %s1058_s15 = sshll.u32 %s1492_s22, 9 }
  0x71   : > { %419 = vmatprep.subr.bf16.mxu0 %v1202_v5  ;;  %v1224_v21 = vld [vmem:[#allocation7 + $0x40] sm:$0xff]   ;;  %v1226_v23 = vld [vmem:[#allocation7 + $0x48] sm:$0xff]   ;;  %v1228_v25 = vld [vmem:[#allocation7 + $0x50] sm:$0xff]   ;;  %s894_s28 = sshll.u32 %s1788_s10, 4  ;;  %s1800_s11 = scalar_lea.hbm %s1850_s5, %s1058_s15  ;;  %s1795_s28 = int_to_ptr.vmem [resolvable:$true] %s894_s28 }
  0x72   : > { %v1225_v22 = vld [vmem:[#allocation7] sm:$0xff]   ;;  %1082 = vmatprep.subr.bf16.mxu1 %v1224_v21  ;;  %v1227_v24 = vld [vmem:[#allocation7 + $0x8] sm:$0xff]   ;;  %v1229_v26 = vld [vmem:[#allocation7 + $0x10] sm:$0xff]   ;;  %v303_v39 = vsub.s32 0, %v302_v38  ;;  %v307_v41 = vsub.s32 1, %v302_v38  ;;  %s881_s23 = scalar_lea.sflag [#allocation4], %s1649_s17 }
  0x73   : > { %1083 = vmatpush3.bf16.msra.mxu1 %v1225_v22  ;;  %v1230_v27 = vld [vmem:[#allocation7 + $0x58] sm:$0xff]   ;;  %v1232_v29 = vld [vmem:[#allocation7 + $0x60] sm:$0xff]   ;;  %v1234_v31 = vld [vmem:[#allocation7 + $0x68] sm:$0xff]   ;;  %s1358_s7 = scalar_lea.vmem %s1795_s28, 512  ;;  %p1864_p0 = scmp.ne.s32.totalorder %s1859_s29, 0 }
  0x74   : > { %420 = vmatpush1.bf16.msra.mxu0 %v1204_v6  ;;  %1084 = vmatprep.subr.bf16.mxu1 %v1226_v23  ;;  %v1231_v28 = vld [vmem:[#allocation7 + $0x18] sm:$0xff]   ;;  %v1233_v30 = vld [vmem:[#allocation7 + $0x20] sm:$0xff]   ;;  %v1235_v32 = vld [vmem:[#allocation7 + $0x28] sm:$0xff]   ;;  %p1359_p11 = scmp.ne.s32.totalorder %s1795_s28, %s1358_s7  ;;  %s1438_s22 = smov [#allocation8]  }
  0x75   : > { %421 = vmatprep.subr.bf16.mxu0 %v1205_v7  ;;  %v1236_v33 = vld [vmem:[#allocation7 + $0x70] sm:$0xff]   ;;  %v1238_v35 = vld [vmem:[#allocation7 + $0x78] sm:$0xff]   ;;  %v299_v40 = vld [vmem:[%s1847_s2] sm:$0x3]  ;;  %s1362_s6 = sshll.u32 %s1438_s22, 4  ;;  %s1363_s6 = int_to_ptr.vmem [resolvable:$false] %s1362_s6 }
  0x76   : > { %v1237_v34 = vld [vmem:[#allocation7 + $0x30] sm:$0xff]   ;;  %v1239_v36 = vld [vmem:[#allocation7 + $0x38] sm:$0xff]   ;;  %v1672_v42 = vrot.slane %v299_v40, %v303_v39  ;;  %v1674_v43 = vrot.slane %v299_v40, %v307_v41  ;;  %p1360_p1 = pnand %p1359_p11, %p1864_p0  ;;  %s1364_s8 = scalar_lea.vmem %s1363_s6, 1024 }
  0x77   : > { %1085 = vmatpush3.bf16.msra.mxu1 %v1227_v24  ;;  %p1365_p5 = scmp.lt.s32.totalorder %s1795_s28, %s1363_s6  ;;  %p1366_p9 = scmp.lt.s32.totalorder %s1364_s8, %s1358_s7 }
  0x78   : > { %422 = vmatpush1.bf16.msra.mxu0 %v1207_v8  ;;  %1086 = vmatprep.subr.bf16.mxu1 %v1228_v25  ;;  %p1361_p3 = pneg %p1360_p1 }
  0x79   : > { %423 = vmatprep.subr.bf16.mxu0 %v1208_v9  ;;  %p1367_p12 = por %p1366_p9, %p1365_p5 }
  0x7b   : > { %1087 = vmatpush3.bf16.msra.mxu1 %v1229_v26  ;;  %p1368_p2 = pnand %p1367_p12, %p1361_p3 }
  0x7c   : > { %424 = vmatpush1.bf16.msra.mxu0 %v1210_v10  ;;  %1088 = vmatprep.subr.bf16.mxu1 %v1230_v27 }
  0x7d   : > { %425 = vmatprep.subr.bf16.mxu0 %v1211_v11 }
  0x7f   : > { %1089 = vmatpush3.bf16.msra.mxu1 %v1231_v28 }
  0x80   : > { %426 = vmatpush1.bf16.msra.mxu0 %v1213_v12  ;;  %1090 = vmatprep.subr.bf16.mxu1 %v1232_v29 }
  0x81   : > { %427 = vmatprep.subr.bf16.mxu0 %v1214_v13 }
  0x83   : > { %1091 = vmatpush3.bf16.msra.mxu1 %v1233_v30 }
  0x84   : > { %428 = vmatpush1.bf16.msra.mxu0 %v1216_v14  ;;  %1092 = vmatprep.subr.bf16.mxu1 %v1234_v31 }
  0x85   : > { %429 = vmatprep.subr.bf16.mxu0 %v1217_v15 }
  0x87   : > { %1093 = vmatpush3.bf16.msra.mxu1 %v1235_v32 }
  0x88   : > { %430 = vmatpush1.bf16.msra.mxu0 %v1219_v16  ;;  %1094 = vmatprep.subr.bf16.mxu1 %v1236_v33 }
  0x8b   : > { %448 = vmatmul.mubr.bf16.vlgmr.msra.gmra.mrb[0].mxu0 %v1220_v17  ;;  %1095 = vmatpush3.bf16.msra.mxu1 %v1237_v34 }
  0x8c   : > { %457 = vmatprep.mubr.bf16.mxu0 %v1437_v0  ;;  %1096 = vmatprep.subr.bf16.mxu1 %v1238_v35 }
  0x8f   : > { %1097 = vmatpush3.bf16.msra.mxu1 %v1239_v36 }
  0x93   : > { %458 = vmatmul.mubr.bf16.gmra.mrb[4].mxu0 %v1221_v18 }
  0x94   : > { %467 = vmatprep.mubr.bf16.mxu0 %v1437_v0 }
  0x9b   : > { %468 = vmatmul.mubr.bf16.gmra.mrb[8].mxu0 %v1222_v19 }
  0x9c   : > { %477 = vmatprep.mubr.bf16.mxu0 %v1437_v0 }
  0xa3   : > { %478 = vmatmul.mubr.bf16.gmra.mrb[12].mxu0 %v1223_v20 }
 0x15e   : > { %v449_v44 = vpop.f32.mrb[0].mxu0 }
 0x15f   : > { %v450_v45 = vadd.f32 %v449_v44, %v1672_v42  ;;  %v451_v46 = vpop.f32.mrb[1].mxu0 }
 0x160   : > { %v452_v47 = vadd.f32 %v451_v46, %v1674_v43  ;;  %v453_v48 = vpop.f32.mrb[2].mxu0 }
 0x161   : > { %v504_v49 = vmul.f32 0.044715, %v450_v45  ;;  %v1679_v50 = vadd.f32 %v453_v48, %v1672_v42  ;;  %v455_v51 = vpop.f32.mrb[3].mxu0  ;;  %v488_v30 = vmul.f32 0.5, %v450_v45 }
 0x162   : > { %v505_v52 = vmul.f32 0.044715, %v452_v47  ;;  %v1682_v53 = vadd.f32 %v455_v51, %v1674_v43  ;;  %v489_v39 = vmul.f32 0.5, %v452_v47 }
 0x163   : > { %v520_v54 = vmul.f32 %v504_v49, %v450_v45  ;;  %v506_v55 = vmul.f32 0.044715, %v1679_v50 }
 0x164   : > { %v507_v56 = vmul.f32 0.044715, %v1682_v53  ;;  %v521_v57 = vmul.f32 %v505_v52, %v452_v47 }
 0x165   : > { %v536_v58 = vmul.f32 %v520_v54, %v450_v45  ;;  %v522_v59 = vmul.f32 %v506_v55, %v1679_v50 }
 0x166   : > { %v459_v60 = vpop.f32.mrb[4].mxu0  ;;  %v523_v61 = vmul.f32 %v507_v56, %v1682_v53  ;;  %v537_v62 = vmul.f32 %v521_v57, %v452_v47 }
 0x167   : > { %v538_v63 = vmul.f32 %v522_v59, %v1679_v50  ;;  %v1690_v0 = vadd.f32 %v459_v60, %v1672_v42  ;;  %v461_v1 = vpop.f32.mrb[5].mxu0  ;;  %v552_v2 = vadd.f32 %v536_v58, %v450_v45  ;;  %v491_v58 = vmul.f32 0.5, %v1682_v53 }
 0x168   : > { %v462_v3 = vadd.f32 %v461_v1, %v1674_v43  ;;  %v463_v4 = vpop.f32.mrb[6].mxu0  ;;  %v539_v5 = vmul.f32 %v523_v61, %v1682_v53  ;;  %v553_v6 = vadd.f32 %v537_v62, %v452_v47  ;;  %v490_v59 = vmul.f32 0.5, %v1679_v50 }
 0x169   : > { %v508_v7 = vmul.f32 0.044715, %v1690_v0  ;;  %v1696_v8 = vadd.f32 %v463_v4, %v1672_v42  ;;  %v465_v9 = vpop.f32.mrb[7].mxu0  ;;  %v554_v10 = vadd.f32 %v538_v63, %v1679_v50  ;;  %v568_v11 = vmul.f32 0.7978846, %v552_v2 }
 0x16a   : > { %v509_v12 = vmul.f32 0.044715, %v462_v3  ;;  %v1700_v13 = vadd.f32 %v465_v9, %v1674_v43  ;;  %v555_v14 = vadd.f32 %v539_v5, %v1682_v53  ;;  %v569_v15 = vmul.f32 0.7978846, %v553_v6 }
 0x16b   : > { %v524_v16 = vmul.f32 %v508_v7, %v1690_v0  ;;  %v510_v17 = vmul.f32 0.044715, %v1696_v8  ;;  %v570_v18 = vmul.f32 0.7978846, %v554_v10  ;;  %1240 = vtanh.f32 %v568_v11 }
 0x16c   : > { %v525_v19 = vmul.f32 %v509_v12, %v462_v3  ;;  %v511_v20 = vmul.f32 0.044715, %v1700_v13  ;;  %v571_v21 = vmul.f32 0.7978846, %v555_v14  ;;  %1242 = vtanh.f32 %v569_v15 }
 0x16d   : > { %v540_v22 = vmul.f32 %v524_v16, %v1690_v0  ;;  %v526_v23 = vmul.f32 %v510_v17, %v1696_v8  ;;  %1244 = vtanh.f32 %v570_v18  ;;  %v493_v1 = vmul.f32 0.5, %v462_v3 }
 0x16e   : > { %v541_v24 = vmul.f32 %v525_v19, %v462_v3  ;;  %v527_v25 = vmul.f32 %v511_v20, %v1700_v13  ;;  %v469_v26 = vpop.f32.mrb[8].mxu0  ;;  %1246 = vtanh.f32 %v571_v21 }
 0x16f   : > { %v542_v27 = vmul.f32 %v526_v23, %v1696_v8  ;;  %v1711_v28 = vadd.f32 %v469_v26, %v1672_v42  ;;  %v471_v29 = vpop.f32.mrb[9].mxu0  ;;  %v556_v35 = vadd.f32 %v540_v22, %v1690_v0 }
 0x170   : > { %v543_v31 = vmul.f32 %v527_v25, %v1700_v13  ;;  %v1715_v32 = vadd.f32 %v471_v29, %v1674_v43  ;;  %v473_v33 = vpop.f32.mrb[10].mxu0  ;;  %v557_v34 = vadd.f32 %v541_v24, %v462_v3 }
 0x171   : > { %v512_v36 = vmul.f32 0.044715, %v1711_v28  ;;  %v1720_v37 = vadd.f32 %v473_v33, %v1672_v42  ;;  %v475_v38 = vpop.f32.mrb[11].mxu0  ;;  %v558_v40 = vadd.f32 %v542_v27, %v1696_v8  ;;  %v572_v51 = vmul.f32 0.7978846, %v556_v35 }
 0x172   : > { %v513_v41 = vmul.f32 0.044715, %v1715_v32  ;;  %v1725_v44 = vadd.f32 %v475_v38, %v1674_v43  ;;  %v559_v45 = vadd.f32 %v543_v31, %v1700_v13  ;;  %v573_v46 = vmul.f32 0.7978846, %v557_v34 }
 0x173   : > { %v528_v48 = vmul.f32 %v512_v36, %v1711_v28  ;;  %v514_v49 = vmul.f32 0.044715, %v1720_v37  ;;  %v574_v52 = vmul.f32 0.7978846, %v558_v40  ;;  %v492_v38 = vmul.f32 0.5, %v1690_v0 }
 0x174   : > { %v529_v54 = vmul.f32 %v513_v41, %v1715_v32  ;;  %v515_v47 = vmul.f32 0.044715, %v1725_v44  ;;  %v575_v55 = vmul.f32 0.7978846, %v559_v45  ;;  %1248 = vtanh.f32 %v573_v46 }
 0x175   : > { %v1241_v56 = vpop.eup %1240  ;;  %v530_v57 = vmul.f32 %v514_v49, %v1720_v37  ;;  %1250 = vtanh.f32 %v572_v51  ;;  %v544_v50 = vmul.f32 %v528_v48, %v1711_v28 }
 0x176   : > { %v1243_v60 = vpop.eup %1242  ;;  %v531_v61 = vmul.f32 %v515_v47, %v1725_v44  ;;  %v479_v62 = vpop.f32.mrb[12].mxu0  ;;  %v600_v63 = vadd.f32 1.0, %v1241_v56  ;;  %1252 = vtanh.f32 %v575_v55  ;;  %v545_v4 = vmul.f32 %v529_v54, %v1715_v32 }
 0x177   : > { %v1245_v2 = vpop.eup %1244  ;;  %v1738_v5 = vadd.f32 %v479_v62, %v1672_v42  ;;  %v481_v6 = vpop.f32.mrb[13].mxu0  ;;  %v601_v7 = vadd.f32 1.0, %v1243_v60  ;;  %1254 = vtanh.f32 %v574_v52  ;;  %v546_v12 = vmul.f32 %v530_v57, %v1720_v37 }
 0x178   : > { %v1247_v53 = vpop.eup %1246  ;;  %v547_v9 = vmul.f32 %v531_v61, %v1725_v44  ;;  %v1743_v10 = vadd.f32 %v481_v6, %v1674_v43  ;;  %v483_v11 = vpop.f32.mrb[14].mxu0  ;;  %v602_v3 = vadd.f32 1.0, %v1245_v2  ;;  %v616_v20 = vmul.f32 %v600_v63, %v488_v30 }
 0x179   : > { %v516_v14 = vmul.f32 0.044715, %v1738_v5  ;;  %v1748_v15 = vadd.f32 %v483_v11, %v1672_v42  ;;  %v485_v16 = vpop.f32.mrb[15].mxu0  ;;  %v603_v17 = vadd.f32 1.0, %v1247_v53  ;;  %v617_v23 = vmul.f32 %v601_v7, %v489_v39 }
 0x17a   : > { %v517_v18 = vmul.f32 0.044715, %v1743_v10  ;;  %v1752_v19 = vadd.f32 %v485_v16, %v1674_v43  ;;  %v618_v21 = vmul.f32 %v602_v3, %v490_v59  ;;  %v561_v25 = vadd.f32 %v545_v4, %v1715_v32 }
 0x17b   : > { %v518_v22 = vmul.f32 0.044715, %v1748_v15  ;;  %v619_v24 = vmul.f32 %v603_v17, %v491_v58  ;;  %v563_v29 = vadd.f32 %v547_v9, %v1725_v44  ;;  %v532_v31 = vmul.f32 %v516_v14, %v1738_v5 }
 0x17c   : > { %v533_v26 = vmul.f32 %v517_v18, %v1743_v10  ;;  %v519_v42 = vmul.f32 0.044715, %v1752_v19  ;;  %v632_v27 = vpack.c.bf16 %v618_v21, %v616_v20  ;;  %v495_v43 = vmul.f32 0.5, %v1700_v13 }
 0x17d   : > { %v633_v33 = vpack.c.bf16 %v619_v24, %v617_v23  ;;  %v577_v30 = vmul.f32 0.7978846, %v561_v25  ;;  %v534_v35 = vmul.f32 %v518_v22, %v1748_v15  ;;  %v579_v39 = vmul.f32 0.7978846, %v563_v29 }
 0x17e   : > { %v1249_v34 = vpop.eup %1248  ;;  %v535_v36 = vmul.f32 %v519_v42, %v1752_v19  ;;  %v549_v41 = vmul.f32 %v533_v26, %v1743_v10  ;;  %v560_v46 = vadd.f32 %v544_v50, %v1711_v28  ;;  %v562_v51 = vadd.f32 %v546_v12, %v1720_v37 }
 0x17f   : > { %v1251_v40 = vpop.eup %1250  ;;  %807 = vmatprep.mubr.bf16.mxu1 %v633_v33  ;;  %v605_v45 = vadd.f32 1.0, %v1249_v34  ;;  %1256 = vtanh.f32 %v577_v30  ;;  %v548_v0 = vmul.f32 %v532_v31, %v1738_v5  ;;  %v494_v47 = vmul.f32 0.5, %v1696_v8 }
 0x180   : > { %v1253_v48 = vpop.eup %1252  ;;  %v551_v13 = vmul.f32 %v535_v36, %v1752_v19  ;;  %808 = vmatmul.mubr.bf16.vlgmr.msra.gmra.mrb[0].mxu1 %v632_v27  ;;  %v604_v49 = vadd.f32 1.0, %v1251_v40  ;;  %1258 = vtanh.f32 %v579_v39  ;;  %v576_v55 = vmul.f32 0.7978846, %v560_v46 }
 0x181   : > { %v1255_v52 = vpop.eup %1254  ;;  %v607_v54 = vadd.f32 1.0, %v1253_v48  ;;  %v550_v56 = vmul.f32 %v534_v35, %v1748_v15  ;;  %v621_v57 = vmul.f32 %v605_v45, %v493_v1  ;;  %v578_v59 = vmul.f32 0.7978846, %v562_v51 }
 0x182   : > { %v606_v58 = vadd.f32 1.0, %v1255_v52  ;;  %1260 = vtanh.f32 %v576_v55  ;;  %v565_v61 = vadd.f32 %v549_v41, %v1743_v10  ;;  %v567_v62 = vadd.f32 %v551_v13, %v1752_v19 }
 0x183   : > { %v623_v60 = vmul.f32 %v607_v54, %v495_v43  ;;  %v620_v63 = vmul.f32 %v604_v49, %v492_v38  ;;  %1262 = vtanh.f32 %v578_v59  ;;  %v564_v8 = vadd.f32 %v548_v0, %v1738_v5 }
 0x184   : > { %v622_v2 = vmul.f32 %v606_v58, %v494_v47  ;;  %v581_v6 = vmul.f32 0.7978846, %v565_v61  ;;  %v583_v7 = vmul.f32 0.7978846, %v567_v62  ;;  %v566_v50 = vadd.f32 %v550_v56, %v1748_v15 }
 0x185   : > { %v635_v4 = vpack.c.bf16 %v623_v60, %v621_v57  ;;  %v580_v1 = vmul.f32 0.7978846, %v564_v8  ;;  %v497_v14 = vmul.f32 0.5, %v1715_v32  ;;  %v499_v16 = vmul.f32 0.5, %v1725_v44 }
 0x186   : > { %v634_v53 = vpack.c.bf16 %v622_v2, %v620_v63  ;;  %1264 = vtanh.f32 %v581_v6  ;;  %v582_v9 = vmul.f32 0.7978846, %v566_v50  ;;  %v496_v25 = vmul.f32 0.5, %v1711_v28 }
 0x187   : > { %815 = vmatprep.mubr.bf16.mxu1 %v635_v4  ;;  %1266 = vtanh.f32 %v583_v7  ;;  %v498_v26 = vmul.f32 0.5, %v1720_v37  ;;  %v501_v30 = vmul.f32 0.5, %v1743_v10  ;;  %v503_v34 = vmul.f32 0.5, %v1752_v19 }
 0x188   : > { %816 = vmatmul.mubr.bf16.gmra.mrb[4].mxu1 %v634_v53  ;;  %1268 = vtanh.f32 %v580_v1  ;;  %v500_v38 = vmul.f32 0.5, %v1738_v5  ;;  %v502_v40 = vmul.f32 0.5, %v1748_v15  ;;  %v1019_v5 = vld [vmem:[%s1849_s4] ss:$0 sm:$0xff] }
 0x189   : > { %v1257_v11 = vpop.eup %1256  ;;  %1270 = vtanh.f32 %v582_v9 }
 0x18a   : > { %v1259_v3 = vpop.eup %1258  ;;  %v609_v12 = vadd.f32 1.0, %v1257_v11 }
 0x18b   : > { %v611_v17 = vadd.f32 1.0, %v1259_v3 }
 0x18c   : > { %v1261_v18 = vpop.eup %1260  ;;  %v625_v20 = vmul.f32 %v609_v12, %v497_v14 }
 0x18d   : > { %v627_v21 = vmul.f32 %v611_v17, %v499_v16  ;;  %v1263_v22 = vpop.eup %1262  ;;  %v608_v23 = vadd.f32 1.0, %v1261_v18 }
 0x18e   : > { %v610_v42 = vadd.f32 1.0, %v1263_v22 }
 0x18f   : > { %v637_v24 = vpack.c.bf16 %v627_v21, %v625_v20  ;;  %v624_v29 = vmul.f32 %v608_v23, %v496_v25 }
 0x190   : > { %v1265_v27 = vpop.eup %1264  ;;  %v626_v31 = vmul.f32 %v610_v42, %v498_v26 }
 0x191   : > { %823 = vmatprep.mubr.bf16.mxu1 %v637_v24  ;;  %v1267_v33 = vpop.eup %1266  ;;  %v613_v32 = vadd.f32 1.0, %v1265_v27 }
 0x192   : > { %v1269_v43 = vpop.eup %1268  ;;  %v636_v44 = vpack.c.bf16 %v626_v31, %v624_v29  ;;  %v615_v35 = vadd.f32 1.0, %v1267_v33 }
 0x193   : > { %v1271_v36 = vpop.eup %1270  ;;  %v612_v28 = vadd.f32 1.0, %v1269_v43  ;;  %v629_v37 = vmul.f32 %v613_v32, %v501_v30 }
 0x194   : > { %824 = vmatmul.mubr.bf16.gmra.mrb[8].mxu1 %v636_v44  ;;  %v631_v39 = vmul.f32 %v615_v35, %v503_v34  ;;  %v614_v41 = vadd.f32 1.0, %v1271_v36 }
 0x195   : > { %v628_v46 = vmul.f32 %v612_v28, %v500_v38 }
 0x196   : > { %v639_v45 = vpack.c.bf16 %v631_v39, %v629_v37  ;;  %v630_v48 = vmul.f32 %v614_v41, %v502_v40 }
 0x198   : > { %831 = vmatprep.mubr.bf16.mxu1 %v639_v45  ;;  %v638_v13 = vpack.c.bf16 %v630_v48, %v628_v46 }
 0x19c   : > { %832 = vmatmul.mubr.bf16.gmra.mrb[12].mxu1 %v638_v13 }
 0x253   : > { %v1098_v10 = vpop.f32.mrb[0].mxu1 }
 0x254   : > { %v1099_v19 = vpop.f32.mrb[1].mxu1 }
 0x255   : > { %v1100_v49 = vadd.f32 %v1099_v19, %v1098_v10  ;;  %v1101_v51 = vpop.f32.mrb[2].mxu1 }
 0x256   : > { %v1102_v52 = vpop.f32.mrb[3].mxu1 }
 0x257   : > { %v1103_v0 = vadd.f32 %v1102_v52, %v1101_v51  ;;  %v810_v54 = vadd.f32 %v1100_v49, %v1019_v5 }
 0x259   : > { %v813_v15 = vadd.f32 %v1103_v0, %v1019_v5 }
 0x25b   : > { %v1062_v47 = vpack.c.bf16 %v813_v15, %v810_v54  ;;  %v1104_v55 = vpop.f32.mrb[4].mxu1 }
 0x25c   : > { %v1105_v56 = vpop.f32.mrb[5].mxu1 }
 0x25d   : > { %1063 = vst [vmem:[%s1788_s10] sm:$0xff] %v1062_v47   ;;  %v1106_v57 = vadd.f32 %v1105_v56, %v1104_v55  ;;  %v1107_v58 = vpop.f32.mrb[6].mxu1 }
 0x25e   : > { %v1108_v59 = vpop.f32.mrb[7].mxu1 }
 0x25f   : > { %v1109_v60 = vadd.f32 %v1108_v59, %v1107_v58  ;;  %v818_v61 = vadd.f32 %v1106_v57, %v1019_v5 }
 0x261   : > { %v821_v62 = vadd.f32 %v1109_v60, %v1019_v5 }
 0x263   : > { %v1067_v63 = vpack.c.bf16 %v821_v62, %v818_v61 }
 0x265   : > { %1079 = vst [vmem:[%s1788_s10 + $0x8] sm:$0xff] %v1067_v63  }
 0x267   : > { %v1110_v2 = vpop.f32.mrb[8].mxu1 }
 0x268   : > { %v1111_v4 = vpop.f32.mrb[9].mxu1 }
 0x269   : > { %v1112_v6 = vadd.f32 %v1111_v4, %v1110_v2  ;;  %v1113_v7 = vpop.f32.mrb[10].mxu1 }
 0x26a   : > { %v1114_v8 = vpop.f32.mrb[11].mxu1 }
 0x26b   : > { %v1115_v53 = vadd.f32 %v1114_v8, %v1113_v7  ;;  %v826_v50 = vadd.f32 %v1112_v6, %v1019_v5 }
 0x26d   : > { %v829_v1 = vadd.f32 %v1115_v53, %v1019_v5 }
 0x26f   : > { %v1072_v9 = vpack.c.bf16 %v829_v1, %v826_v50  ;;  %v1116_v11 = vpop.f32.mrb[12].mxu1 }
 0x270   : > { %v1117_v3 = vpop.f32.mrb[13].mxu1 }
 0x271   : > { %1080 = vst [vmem:[%s1788_s10 + $0x10] sm:$0xff] %v1072_v9   ;;  %v1118_v12 = vadd.f32 %v1117_v3, %v1116_v11  ;;  %v1119_v14 = vpop.f32.mrb[14].mxu1 }
 0x272   : > { %v1120_v16 = vpop.f32.mrb[15].mxu1 }
 0x273   : > { %v1121_v17 = vadd.f32 %v1120_v16, %v1119_v14  ;;  %v834_v18 = vadd.f32 %v1118_v12, %v1019_v5 }
 0x275   : > { %v837_v20 = vadd.f32 %v1121_v17, %v1019_v5 }
 0x277   : > { %v1077_v21 = vpack.c.bf16 %v837_v20, %v834_v18 }
 0x279   : > { %1081 = vst [vmem:[%s1788_s10 + $0x18] sm:$0xff] %v1077_v21  }
 0x27a   : > { %1371 = shalt.err (!%p1368_p2)
}
 0x27b   : > { %s1372_s14 = scalar_lea.hbm %s1800_s11, 512  ;;  %s1376_s12 = scalar_lea.hbm %s1850_s5, 1024 }
 0x27c   : > { %p1373_p13 = scmp.ne.s32.totalorder %s1800_s11, %s1372_s14  ;;  %p1377_p4 = scmp.lt.u32.totalorder %s1800_s11, %s1850_s5 }
 0x27d   : > { %p1378_p7 = scmp.lt.u32.totalorder %s1376_s12, %s1372_s14  ;;  %p1380_p11 = scmp.lt.u32.totalorder %s1372_s14, %s1800_s11 }
 0x27e   : > { %p1374_p6 = pnand %p1373_p13, %p1864_p0 }
 0x27f   : > { %p1379_p8 = por %p1378_p7, %p1377_p4 }
 0x280   : > { %p1375_p10 = pneg %p1374_p6 }
 0x281   : > { %p1381_p1 = por %p1380_p11, %p1379_p8 }
 0x283   : > { %p1382_p3 = pnand %p1381_p1, %p1375_p10 }
 0x285   : > { %1385 = shalt.err (!%p1382_p3)
}
 0x286   : > { %s1439_s15 = smov 64   ;;  %s1440_s9 = smov 4  }
 0x287   : > { %1132 = dma.vmem_to_hbm [thread:$0]  (%p1864_p0), %s1795_s28, 512, %s1800_s11, %s881_s23, %s1439_s15, %s1439_s15, %s1440_s9  }
 0x288 PF: > { %s909_s30 = sand.u32 1, %s1416_s18   ;;  %p1865_p5 = scmp.ne.s32.totalorder %s1855_s25, 0 }
 0x289   : > { %p1866_p9 = scmp.ge.s32.totalorder %s1428_s21, 2  ;;  %s910_s7 = scalar_lea.sflag [#allocation4], %s909_s30 }
 0x28b   : > { %p1146_p12 = pnand %p1866_p9, %p1865_p5 }
 0x28d   : > { %1411 = dma.done.wait (!%p1146_p12), %s910_s7, 512  }
 0x28e   : > { %1413 = vsyncadd (!%p1146_p12), %s910_s7, 4294966784  ;;  %p19_p2 = scmp.ge.s32.totalorder %s1584_s16, 4   ;;  %s1867_s18 = smov %s1420_s19 }
 0x28f   : > { %s1868_s19 = smov %s1424_s20  ;;  %s1869_s20 = smov %s1593_s27 }
 0x290   : > { %s1870_s21 = smov %s1584_s16  ;;  %21 = sbr.rel (!%p19_p2) target bundleno = 6 (0x6), region = 93 }
 0x297   :  { %915 = vsyncpa [#allocation3], 1 }
 0x298   :  { %917 = vsyncpa [#allocation3 + $0x1], 1 }
 0x299   :  { %918 = vsyncpa [#allocation6], 1 }
 0x29a   :  { %919 = vsyncpa [#allocation4], 1 }
 0x29b   :  { %921 = vsyncpa [#allocation4 + $0x1], 1 }

</bundles_post_ra>
